<compile_context>
chip_gen: v7x
topology: tpu7x:2x2x1
jax: 0.10.0
libtpu: 0.0.40
codegen_flags: <defaults>
</compile_context>

<pallas_src>
import functools
import math

import jax
import jax.numpy as jnp
from jax.experimental import pallas as pl
from jax.experimental.pallas import tpu as pltpu

_LANES = 128
_MAX_BLOCK_ROWS = 2048   # 2048 rows * 128 lanes * 4 B = 1 MiB per output block


def _bits_to_uniform(bits_u32):
    """uint32 random words -> float32 uniform samples in [0, 1)."""
    # 23 random bits into the mantissa of a float in [1, 2), then shift down.
    mantissa = (bits_u32 >> jnp.uint32(9)) | jnp.uint32(0x3F800000)
    return jax.lax.bitcast_convert_type(mantissa, jnp.float32) - jnp.float32(1.0)


def _random_node_kernel(bits_ref, out_ref, *, distribution, bernoulli_p):
    """Transform one (block_rows, 128) tile of raw bits into random features."""
    if distribution == "uniform":
        # UniformRENodeEncoder: torch.rand -> U[0, 1)
        out_ref[...] = _bits_to_uniform(bits_ref[...])
    elif distribution == "bernoulli":
        # BernoulliRENodeEncoder: torch.bernoulli(p) -> {0., 1.}
        # Integer-threshold compare on raw bits (skips float conversion).
        p = min(max(float(bernoulli_p), 0.0), 1.0)
        thr = min(int(round(p * 4294967296.0)), 4294967295)
        out_ref[...] = (bits_ref[...] < jnp.uint32(thr)).astype(jnp.float32)
    elif distribution == "normal":
        # NormalRENodeEncoder: torch.randn -> N(0, 1) via Box-Muller, using
        # BOTH outputs: cos branch -> top sublane half, sin branch -> bottom.
        n_rows = out_ref.shape[0]
        half = n_rows // 2            # wrapper keeps block row counts even
        u1 = _bits_to_uniform(bits_ref[0:half, :])
        u2 = _bits_to_uniform(bits_ref[half:n_rows, :])
        # (1 - u1) is in (0, 1], avoids log(0).
        r = jnp.sqrt(jnp.float32(-2.0) * jnp.log(jnp.float32(1.0) - u1))
        theta = jnp.float32(2.0 * math.pi) * u2
        out_ref[0:half, :] = r * jnp.cos(theta)
        out_ref[half:n_rows, :] = r * jnp.sin(theta)
    else:
        raise ValueError(f"unknown distribution: {distribution}")


def random_node_features(num_nodes, dim_emb, *, distribution="normal",
                         bernoulli_p=0.5, seed=0,
                         max_block_rows=_MAX_BLOCK_ROWS):
    """Pallas-generated random node features of shape (num_nodes, dim_emb).

    num_nodes and dim_emb must be static Python ints.
    """
    total = int(num_nodes) * int(dim_emb)
    rows = int(pl.cdiv(total, _LANES))
    if distribution == "normal":
        rows += rows % 2              # even rows -> sublane halves pair up
    rows = max(rows, 1)

    # Big blocks (1 MiB of output) amortize per-step overhead; cap keeps
    # double-buffered in+out comfortably inside v7x's 64 MiB VMEM.
    block_rows = rows if rows <= max_block_rows else max_block_rows
    grid = int(pl.cdiv(rows, block_rows))

    bits = jax.random.bits(jax.random.PRNGKey(seed), (rows, _LANES),
                           dtype=jnp.uint32)

    kernel = functools.partial(_random_node_kernel,
                               distribution=distribution,
                               bernoulli_p=bernoulli_p)
    out = pl.pallas_call(
        kernel,
        out_shape=jax.ShapeDtypeStruct((rows, _LANES), jnp.float32),
        grid=(grid,),
        in_specs=[pl.BlockSpec((block_rows, _LANES), lambda i: (i, 0))],
        out_specs=pl.BlockSpec((block_rows, _LANES), lambda i: (i, 0)),
        compiler_params=pltpu.CompilerParams(
            dimension_semantics=("parallel",)),   # blocks are independent
    )(bits)

    flat = out.reshape(-1)
    if rows * _LANES != total:
        flat = flat[:total]           # copy only when lane padding was needed
    return flat.reshape(num_nodes, dim_emb)


class RandomNodeEncoder:
    """JAX/Pallas port of graphgym's RandomNodeEncoder (concrete variants).

    __call__(batch): batch['x'] = generator(batch['num_nodes']); return batch
    """

    def __init__(self, dim_emb, distribution="normal", bernoulli_p=0.5,
                 expand_x: bool = False, seed: int = 0):
        if expand_x:
            raise NotImplementedError
        self.dim_emb = dim_emb
        self.expand_x = expand_x
        self.distribution = distribution
        self.bernoulli_p = bernoulli_p
        self.seed = seed

    def __repr__(self):
        return (f"{self.__class__.__name__}(dim_emb={self.dim_emb!r}, "
                f"expand_x={self.expand_x!r})")

    def __call__(self, batch):
        batch = dict(batch)
        batch["x"] = random_node_features(
            batch["num_nodes"], self.dim_emb,
            distribution=self.distribution,
            bernoulli_p=self.bernoulli_p,
            seed=self.seed,
        )
        return batch


if __name__ == "__main__":
    key = jax.random.PRNGKey(0)
    k_edge, k_x = jax.random.split(key)

    # Small synthetic graph batch (values of edge_index / old x are irrelevant
    # to the forward semantics — x is fully replaced).
    num_nodes = 10
    dim_emb = 32
    num_edges = 24
    batch = {
        "num_nodes": num_nodes,
        "edge_index": jax.random.randint(k_edge, (2, num_edges), 0, num_nodes,
                                         dtype=jnp.int32),
        "x": jax.random.normal(k_x, (num_nodes, 3), dtype=jnp.float32),
    }

    ok = True
    for dist in ("normal", "uniform", "bernoulli"):
        enc = RandomNodeEncoder(dim_emb, distribution=dist, seed=0)
        out_batch = enc(batch)
        x = jax.block_until_ready(out_batch["x"])
        assert x.shape == (num_nodes, dim_emb), x.shape
        assert x.dtype == jnp.float32, x.dtype
        assert bool(jnp.all(jnp.isfinite(x)))
        if dist == "uniform":
            assert bool(jnp.all((x >= 0.0) & (x < 1.0)))
        if dist == "bernoulli":
            assert bool(jnp.all((x == 0.0) | (x == 1.0)))
        # Determinism check: same seed -> same features.
        x2 = jax.block_until_ready(enc(batch)["x"])
        ok = ok and bool(jnp.all(x == x2))

    if ok:
        print("KERNEL_OK")
</pallas_src>

<mosaic_0001>
module attributes {stable_mosaic.version = 11 : i64} {
  func.func @_random_node_kernel(%arg0: i32, %arg1: memref<4x128xi32, #tpu.memory_space<vmem>>, %arg2: memref<4x128xf32, #tpu.memory_space<vmem>>) attributes {dimension_semantics = [#tpu.dimension_semantics<parallel>], iteration_bounds = array<i64: 1>, scalar_prefetch = 0 : i64, scratch_operands = 0 : i64, tpu.core_type = #tpu.core_type<tc>, window_params = [{transform_indices = @transform_0, window_bounds = array<i64: 4, 128>}, {transform_indices = @transform_1, window_bounds = array<i64: 4, 128>}]} {
    %c0 = arith.constant 0 : index
    %c0_0 = arith.constant 0 : index
    %0 = vector.load %arg1[%c0, %c0_0] : memref<4x128xi32, #tpu.memory_space<vmem>>, vector<2x128xi32>
    %c9_i32 = arith.constant 9 : i32
    %1 = vector.broadcast %c9_i32 : i32 to vector<2x128xi32>
    %2 = arith.shrui %0, %1 : vector<2x128xi32>
    %c1065353216_i32 = arith.constant 1065353216 : i32
    %3 = vector.broadcast %c1065353216_i32 : i32 to vector<2x128xi32>
    %4 = arith.ori %2, %3 : vector<2x128xi32>
    %5 = tpu.bitcast %4 : vector<2x128xi32> -> vector<2x128xf32>
    %cst = arith.constant 1.000000e+00 : f32
    %6 = vector.broadcast %cst : f32 to vector<2x128xf32>
    %7 = arith.subf %5, %6 : vector<2x128xf32>
    %c2 = arith.constant 2 : index
    %c0_1 = arith.constant 0 : index
    %8 = vector.load %arg1[%c2, %c0_1] : memref<4x128xi32, #tpu.memory_space<vmem>>, vector<2x128xi32>
    %c9_i32_2 = arith.constant 9 : i32
    %9 = vector.broadcast %c9_i32_2 : i32 to vector<2x128xi32>
    %10 = arith.shrui %8, %9 : vector<2x128xi32>
    %c1065353216_i32_3 = arith.constant 1065353216 : i32
    %11 = vector.broadcast %c1065353216_i32_3 : i32 to vector<2x128xi32>
    %12 = arith.ori %10, %11 : vector<2x128xi32>
    %13 = tpu.bitcast %12 : vector<2x128xi32> -> vector<2x128xf32>
    %cst_4 = arith.constant 1.000000e+00 : f32
    %14 = vector.broadcast %cst_4 : f32 to vector<2x128xf32>
    %15 = arith.subf %13, %14 : vector<2x128xf32>
    %cst_5 = arith.constant 1.000000e+00 : f32
    %16 = vector.broadcast %cst_5 : f32 to vector<2x128xf32>
    %17 = arith.subf %16, %7 : vector<2x128xf32>
    %18 = math.log %17 : vector<2x128xf32>
    %cst_6 = arith.constant -2.000000e+00 : f32
    %19 = vector.broadcast %cst_6 : f32 to vector<2x128xf32>
    %20 = arith.mulf %19, %18 : vector<2x128xf32>
    %21 = math.sqrt %20 : vector<2x128xf32>
    %cst_7 = arith.constant 6.28318548 : f32
    %22 = vector.broadcast %cst_7 : f32 to vector<2x128xf32>
    %23 = arith.mulf %22, %15 : vector<2x128xf32>
    %24 = math.cos %23 : vector<2x128xf32>
    %25 = arith.mulf %21, %24 : vector<2x128xf32>
    %c0_8 = arith.constant 0 : index
    %c0_9 = arith.constant 0 : index
    %26 = vector.load %arg2[%c0_8, %c0_9] : memref<4x128xf32, #tpu.memory_space<vmem>>, vector<2x128xf32>
    tpu.vector_store %arg2[%c0_8, %c0_9], %25 {strides = array<i32>} : memref<4x128xf32, #tpu.memory_space<vmem>>, vector<2x128xf32>,
    %27 = math.sin %23 : vector<2x128xf32>
    %28 = arith.mulf %21, %27 : vector<2x128xf32>
    %c2_10 = arith.constant 2 : index
    %c0_11 = arith.constant 0 : index
    %29 = vector.load %arg2[%c2_10, %c0_11] : memref<4x128xf32, #tpu.memory_space<vmem>>, vector<2x128xf32>
    tpu.vector_store %arg2[%c2_10, %c0_11], %28 {strides = array<i32>} : memref<4x128xf32, #tpu.memory_space<vmem>>, vector<2x128xf32>,
    return
  }
  func.func @transform_0(%arg0: i32) -> (i32, i32) {
    %c0_i32 = arith.constant 0 : i32
    %c0_i32_0 = arith.constant 0 : i32
    return %arg0, %c0_i32 : i32, i32
  }
  func.func @transform_1(%arg0: i32) -> (i32, i32) {
    %c0_i32 = arith.constant 0 : i32
    %c0_i32_0 = arith.constant 0 : i32
    return %arg0, %c0_i32 : i32, i32
  }
}

</mosaic_0001>

<bundles_post_ra>
// kernel: tpu_custom_call.1
= control target key start
LH: loop header
LB: loop body
LE: loop exit
PB: predicated region body
PF: predicated region fallthrough
CT: control target
= control target key end

     0   :  { %6 = vsyncpa [#allocation3], 0  ;;  %s413_s0 = inlined_call_operand.hbm [shape: u32[4,128], index: 0, kind: input, shape index: {}]   ;;  %s414_s1 = inlined_call_operand.hbm [shape: f32[4,128], index: 1, kind: output, shape index: {}]  }
   0x1   :  { %7 = vsyncpa [#allocation4], 0  ;;  %s347_s6 = smov [#allocation2]   ;;  %s299_s10 = scalar_lea.hbm %s413_s0, 64 }
   0x2   :  { %s14_s7 = sshll.u32 %s347_s6, 4  ;;  %p300_p0 = scmp.ne.s32.totalorder %s413_s0, %s299_s10  ;;  %s15_s7 = int_to_ptr.vmem [resolvable:$true] %s14_s7 }
   0x3   :  { %p303_p1 = scmp.lt.u32.totalorder %s299_s10, %s413_s0 }
   0x5   :  { %p305_p2 = pnand %p303_p1, %p300_p0 }
   0x7   :  { %308 = shalt.err (!%p305_p2)
}
   0x8   :  { %s309_s15 = scalar_lea.vmem %s15_s7, 64  ;;  %p314_p4 = scmp.lt.s32.totalorder %s15_s7, %s15_s7 }
   0x9   :  { %p310_p3 = scmp.ne.s32.totalorder %s15_s7, %s309_s15  ;;  %p315_p5 = scmp.lt.s32.totalorder %s309_s15, %s309_s15 }
   0xb   :  { %p316_p6 = por %p315_p5, %p314_p4 }
   0xd   :  { %p317_p7 = pnand %p316_p6, %p310_p3 }
   0xf   :  { %320 = shalt.err (!%p317_p7)
}
  0x10   :  { %17 = dma.hbm_to_vmem [thread:$0]  %s413_s0, 64, %s15_s7, [#allocation3]  }
  0x11   :  { %343 = dma.done.wait [#allocation3], 64  }
  0x12   :  { %344 = vsyncadd [#allocation3], 4294967232  ;;  %v26_v0 = vld [vmem:[#allocation2 + $0x2] sm:$0x3]  ;;  %v348_v15 = vmov 683565275  }
  0x13   :  { %v27_v1 = vshrl.u32 %v26_v0, 9  ;;  %v349_v17 = vmov 2475754826   ;;  %v350_v19 = vmov 2131351028   ;;  %s354_s0 = smov [#allocation5]  }
  0x14   :  { %v351_v23 = vmov 2102212464   ;;  %v352_v28 = vmov 920167782   ;;  %v353_v34 = vmov 1326507024  }
  0x15   :  { %v28_v2 = vor.u32 1065353216, %v27_v1  ;;  %v21_v38 = vld [vmem:[#allocation2] sm:$0x3]  ;;  %s260_s18 = sshll.u32 %s354_s0, 4  ;;  %s261_s18 = int_to_ptr.vmem [resolvable:$true] %s260_s18 }
  0x16   :  { %v22_v48 = vshrl.u32 %v21_v38, 9  ;;  %s321_s19 = scalar_lea.vmem %s261_s18, 64  ;;  %p326_p9 = scmp.lt.s32.totalorder %s261_s18, %s261_s18 }
  0x17   :  { %v270_v3 = vadd.f32 -1.0, %v28_v2  ;;  %p322_p8 = scmp.ne.s32.totalorder %s261_s18, %s321_s19  ;;  %p327_p10 = scmp.lt.s32.totalorder %s321_s19, %s321_s19 }
  0x18   :  { %v23_v58 = vor.u32 1065353216, %v22_v48 }
  0x19   :  { %v377_v4 = vmul.f32 6.2831855, %v270_v3  ;;  %p328_p11 = por %p327_p10, %p326_p9 }
  0x1a   :  { %v269_v62 = vadd.f32 -1.0, %v23_v58 }
  0x1b   :  { %v46_v5 = vand.u32 2139095040, %v377_v4  ;;  %v43_v9 = vand.u32 2147483647, %v377_v4  ;;  %vm45_vm7 = vcmp.lt.s32.totalorder %v377_v4, 0  ;;  %p329_p12 = pnand %p328_p11, %p322_p8 }
  0x1c   :  { %v31_v1 = vsub.f32 1.0, %v269_v62 }
  0x1d   :  { %v47_v6 = vshrl.u32 %v46_v5, 23  ;;  %v50_v12 = vand.u32 8388607, %v43_v9  ;;  %vm44_vm8 = vcmp.le.f32.partialorder %v43_v9, 0.7853982 }
  0x1e   :  { %291 = vlog2.f32 %v31_v1 }
  0x1f   :  { %v271_v7 = vadd.s32 4294967169, %v47_v6  ;;  %v51_v26 = vor.u32 8388608, %v50_v12 }
  0x21   :  { %v53_v8 = vadd.s32 1, %v271_v7  ;;  %v91_v41 = vshll.u32 %v51_v26, 8 }
  0x23   :  { %vm54_vm0 = vcmp.gt.s32.totalorder %v53_v8, 0 }
  0x24   :  { %v55_v10 = vsel %vm54_vm0, %v53_v8, 0 }
  0x25   :  { %v57_v11 = vand.u32 31, %v55_v10  ;;  %v56_v13 = vshrl.u32 %v55_v10, 5 }
  0x27   :  { %v58_v14 = vsub.s32 32, %v57_v11  ;;  %v60_v16 = vshll.u32 %v348_v15, %v57_v11  ;;  %v63_v18 = vshll.u32 %v349_v17, %v57_v11  ;;  %v66_v20 = vshll.u32 %v350_v19, %v57_v11 }
  0x28   :  { %v69_v25 = vshll.u32 %v351_v23, %v57_v11  ;;  %v72_v29 = vshll.u32 %v352_v28, %v57_v11  ;;  %vm75_vm1 = vcmp.lt.s32.totalorder %v56_v13, 1  ;;  %vm78_vm2 = vcmp.lt.s32.totalorder %v56_v13, 4  ;;  %v292_v11 = vpop.eup %291 }
  0x29   :  { %v61_v21 = vshrl.u32 %v349_v17, %v58_v14  ;;  %v64_v22 = vshrl.u32 %v350_v19, %v58_v14  ;;  %v67_v24 = vshrl.u32 %v351_v23, %v58_v14  ;;  %v59_v27 = vshrl.u32 %v348_v15, %v58_v14 }
  0x2a   :  { %v70_v33 = vshrl.u32 %v352_v28, %v58_v14  ;;  %v73_v35 = vshrl.u32 %v353_v34, %v58_v14  ;;  %vm77_vm3 = vcmp.lt.s32.totalorder %v56_v13, 3  ;;  %vm76_vm4 = vcmp.lt.s32.totalorder %v56_v13, 2 }
  0x2b   :  { %v62_v30 = vor.u32 %v61_v21, %v60_v16  ;;  %v65_v31 = vor.u32 %v64_v22, %v63_v18  ;;  %v68_v32 = vor.u32 %v67_v24, %v66_v20  ;;  %v33_v16 = vmul.f32 0.6931472, %v292_v11 }
  0x2c   :  { %v71_v36 = vor.u32 %v70_v33, %v69_v25  ;;  %v74_v39 = vor.u32 %v73_v35, %v72_v29 }
  0x2d   :  { %v80_v37 = vsel %vm78_vm2, %v68_v32, 2102212464  ;;  %v83_v40 = vsel %vm75_vm1, %v62_v30, %v65_v31  ;;  %v79_v42 = vsel %vm75_vm1, %v59_v27, %v62_v30  ;;  %v87_v45 = vsel %vm75_vm1, %v65_v31, %v68_v32 }
  0x2e   :  { %v81_v43 = vsel %vm77_vm3, %v65_v31, %v80_v37  ;;  %v84_v44 = vsel %vm78_vm2, %v71_v36, 920167782  ;;  %v88_v47 = vsel %vm78_vm2, %v74_v39, 1326507024  ;;  %v34_v21 = vmul.f32 -2.0, %v33_v16 }
  0x2f   :  { %v85_v46 = vsel %vm77_vm3, %v68_v32, %v84_v44  ;;  %v89_v50 = vsel %vm77_vm3, %v71_v36, %v88_v47  ;;  %v82_v51 = vsel %vm76_vm4, %v79_v42, %v81_v43  ;;  %vm135_vm1 = vweird.f32 %v377_v4 }
  0x30   :  { %v86_v49 = vsel %vm76_vm4, %v83_v40, %v85_v46  ;;  %v90_v52 = vsel %vm76_vm4, %v87_v45, %v89_v50  ;;  %v98_v57 = vmul.u32 %v91_v41, %v82_v51  ;;  %293 = vrsqrt.f32 %v34_v21 }
  0x31   :  { %v386_v53 = vmul.u32.u64.low %v91_v41, %v86_v49  ;;  %v387_v54 = vmul.u32.u64.high %v91_v41, %v86_v49, %v386_v53  ;;  %v389_v55 = vmul.u32.u64.low %v91_v41, %v90_v52  ;;  %v390_v56 = vmul.u32.u64.high %v91_v41, %v90_v52, %v389_v55 }
  0x32   :  { %vm37_vm9 = vcmp.eq.f32.partialorder %v34_v21, inf  ;;  %vm39_vm10 = vcmp.eq.f32.partialorder %v34_v21, 0.0  ;;  %v40_v38 = vand.u32 2147483648, %v34_v21 }
  0x33   :  { %v101_v59 = vadd.s32 1, %v387_v54  ;;  %vm100_vm5 = vc.u32 %v390_v56, %v386_v53  ;;  %v99_v10 = vadd.s32 %v386_v53, %v390_v56 }
  0x35   :  { %v102_v60 = vsel %vm100_vm5, %v101_v59, %v387_v54 }
  0x36   :  { %v103_v61 = vadd.s32 %v102_v60, %v98_v57 }
  0x38   :  { %v104_v63 = vadd.s32 536870912, %v103_v61 }
  0x3a   :  { %v105_v0 = vshrl.u32 %v104_v63, 30  ;;  %v294_v33 = vpop.eup %293 }
  0x3b   :  { %v36_v36 = vmul.f32 %v294_v33, %v34_v21 }
  0x3c   :  { %v106_v2 = vshll.u32 %v105_v0, 30  ;;  %v129_v25 = vsub.s32 4, %v105_v0 }
  0x3d   :  { %v38_v39 = vsel %vm37_vm9, %v34_v21, %v36_v36 }
  0x3e   :  { %v107_v3 = vsub.s32 %v103_v61, %v106_v2  ;;  %v130_v28 = vsel %vm45_vm7, %v129_v25, %v105_v0  ;;  %v41_v44 = vsel %vm39_vm10, %v40_v38, %v38_v39 }
  0x3f   :  { %v132_v31 = vsel %vm44_vm8, 0, %v130_v28 }
  0x40   :  { %v109_v5 = vsub.s32 0, %v107_v3  ;;  %v241_v32 = vadd.s32 3, %v132_v31  ;;  %v136_v34 = vand.u32 3, %v132_v31 }
  0x42   :  { %v272_v6 = vmin.u32 %v109_v5, %v107_v3  ;;  %v242_v35 = vand.u32 3, %v241_v32  ;;  %vm141_vm11 = vcmp.eq.s32.totalorder %v136_v34, 2  ;;  %vm138_vm13 = vcmp.eq.s32.totalorder %v136_v34, 0 }
  0x43   :  { %vm137_vm15 = vcmp.lt.s32.totalorder %v136_v34, 2 }
  0x44   :  { %v111_v7 = vclz %v272_v6  ;;  %vm247_vm12 = vcmp.eq.s32.totalorder %v242_v35, 2  ;;  %vm244_vm14 = vcmp.eq.s32.totalorder %v242_v35, 0  ;;  %vm243_vm0 = vcmp.lt.s32.totalorder %v242_v35, 2 }
  0x46   :  { %v273_v8 = vadd.s32 4294967294, %v111_v7 }
  0x48   :  { %vm274_vm6 = vcmp.lt.s32.totalorder %v273_v8, 0 }
  0x49   :  { %v114_v12 = vsel %vm274_vm6, 0, %v273_v8 }
  0x4a   :  { %v115_v13 = vsub.s32 32, %v114_v12  ;;  %v116_v14 = vshll.u32 %v107_v3, %v114_v12  ;;  %v119_v15 = vsub.s32 4294967266, %v114_v12 }
  0x4c   :  { %v117_v17 = vshrl.u32 %v99_v10, %v115_v13  ;;  %v120_v18 = vadd.s32 127, %v119_v15 }
  0x4e   :  { %v118_v19 = vor.u32 %v117_v17, %v116_v14  ;;  %v121_v20 = vshll.u32 %v120_v18, 23 }
  0x50   :  { %v122_v22 = vor.u32 4788187, %v121_v20  ;;  %v125_v23 = vcvt.s32.f32 %v118_v19 }
  0x52   :  { %v123_v24 = vand.u32 2147483647, %v122_v22 }
  0x54   :  { %v126_v26 = vmul.f32 %v125_v23, %v123_v24 }
  0x56   :  { %v127_v27 = vxor.u32 2147483648, %v126_v26 }
  0x58   :  { %v128_v29 = vsel %vm45_vm7, %v127_v27, %v126_v26 }
  0x59   :  { %v131_v30 = vsel %vm44_vm8, %v377_v4, %v128_v29 }
  0x5a   :  { %295 = vcosq.f32 %v131_v30 }
  0x5b   :  { %297 = vsinq.f32 %v131_v30 }
  0x64   :  { %v296_v37 = vpop.eup %295 }
  0x65   :  { %v298_v9 = vpop.eup %297  ;;  %v142_v40 = vxor.u32 2147483648, %v296_v37 }
  0x66   :  { %v139_v41 = vxor.u32 2147483648, %v298_v9 }
  0x67   :  { %v143_v42 = vsel %vm141_vm11, %v142_v40, %v298_v9  ;;  %v249_v43 = vsel %vm247_vm12, %v142_v40, %v298_v9 }
  0x68   :  { %v140_v45 = vsel %vm138_vm13, %v296_v37, %v139_v41  ;;  %v246_v46 = vsel %vm244_vm14, %v296_v37, %v139_v41 }
  0x69   :  { %v144_v47 = vsel %vm137_vm15, %v140_v45, %v143_v42  ;;  %v250_v48 = vsel %vm243_vm0, %v246_v46, %v249_v43 }
  0x6a   :  { %v145_v49 = vsel %vm135_vm1, nan, %v144_v47  ;;  %v251_v50 = vsel %vm135_vm1, nan, %v250_v48 }
  0x6b   :  { %v146_v51 = vmul.f32 %v145_v49, %v41_v44  ;;  %v252_v52 = vmul.f32 %v251_v50, %v41_v44 }
  0x6d   :  { %147 = vst [vmem:[#allocation5] sm:$0x3] %v146_v51  ;;  %253 = vst [vmem:[#allocation5 + $0x2] sm:$0x3] %v252_v52 }
  0x6e   :  { %332 = shalt.err (!%p329_p12)
}
  0x6f   :  { %s333_s22 = scalar_lea.hbm %s414_s1, 64 }
  0x70   :  { %p334_p13 = scmp.ne.s32.totalorder %s414_s1, %s333_s22  ;;  %p337_p0 = scmp.lt.u32.totalorder %s333_s22, %s414_s1 }
  0x72   :  { %p339_p1 = pnand %p337_p0, %p334_p13 }
  0x74   :  { %342 = shalt.err (!%p339_p1)
}
  0x75   :  { %263 = dma.vmem_to_hbm [thread:$0]  %s261_s18, 64, %s414_s1, [#allocation4]  }
  0x76   :  { %345 = dma.done.wait [#allocation4], 64  }
  0x77   :  { %346 = vsyncadd [#allocation4], 4294967232 }
  0x78   :  { %267 = vsyncpa [#allocation3], 1 }
  0x79   :  { %268 = vsyncpa [#allocation4], 1 }

</bundles_post_ra>
